<compile_context>
chip_gen: v7x
topology: tpu7x:2x2x1
jax: 0.10.0
libtpu: 0.0.40
codegen_flags: <defaults>
</compile_context>

<pallas_src>
import jax
import jax.numpy as jnp
from jax import lax
from jax.experimental import pallas as pl
from jax.experimental.pallas import tpu as pltpu

_EPS = 1e-12  # torch.nn.functional.normalize default eps


def _encoder_head_kernel(feat_ref, w_ref, b_ref, c2a_ref, c_ref, clb_ref,
                         out_ref, av_acc, asum_acc):
    """One (image, spatial-tile) step of the Encoder head (Linear + NetVLAD).

    feat_ref : (E, tn)  feature tile, native channels-first layout
    w_ref    : (E, D)   linear weight, bf16 (VMEM resident)
    b_ref    : (1, D)   linear bias, f32 (resident)
    c2a_ref  : (K, D)   2*alpha*C, f32 (resident)
    c_ref    : (K, D)   C, f32 (resident)
    clb_ref  : (K, 1)   1x1-conv bias = -alpha*||C_k||, f32 (resident)
    out_ref  : (K, D)   VLAD descriptor (written on the last spatial tile)
    av_acc   : (K, D)   scratch accumulator: sum_n a[k,n] * xn[n,d]
    asum_acc : (K, 1)   scratch accumulator: sum_n a[k,n]
    """
    n_idx = pl.program_id(1)

    @pl.when(n_idx == 0)
    def _():
        av_acc[...] = jnp.zeros_like(av_acc)
        asum_acc[...] = jnp.zeros_like(asum_acc)

    # ---- Encoder.linear: contract over E on the MXU (bf16 in, f32 acc) ------
    feat = feat_ref[...].astype(jnp.bfloat16)                     # (E, tn)
    x = lax.dot_general(feat, w_ref[...], (((0,), (0,)), ((), ())),
                        preferred_element_type=jnp.float32)       # (tn, D)
    x = x + b_ref[...]                                            # f32

    # ---- F.normalize(x, p=2, dim=descriptor), f32 epilogue ------------------
    nrm = jnp.sqrt(jnp.sum(x * x, axis=-1, keepdims=True))        # (tn, 1)
    xn = x * pl.reciprocal(jnp.maximum(nrm, _EPS), approx=True)   # (tn, D)

    # ---- soft assignment, lane-dense (K, tn) layout --------------------------
    logits = lax.dot_general(c2a_ref[...], xn, (((1,), (1,)), ((), ())),
                             preferred_element_type=jnp.float32)  # (K, tn)
    logits = logits + clb_ref[...]                                # (K,1) bcast
    m = jnp.max(logits, axis=0, keepdims=True)                    # (1, tn)
    e = jnp.exp(logits - m)                                       # (K, tn)
    denom = jnp.sum(e, axis=0, keepdims=True)                     # (1, tn)
    a = e * pl.reciprocal(denom, approx=True)                     # (K, tn)

    # ---- VLAD accumulation over the spatial axis -----------------------------
    av_acc[...] += lax.dot_general(a, xn, (((1,), (0,)), ((), ())),
                                   preferred_element_type=jnp.float32)  # (K, D)
    asum_acc[...] += jnp.sum(a, axis=1, keepdims=True)                  # (K, 1)

    # ---- finalize: residual + double F.normalize, lane-dense store -----------
    @pl.when(n_idx == pl.num_programs(1) - 1)
    def _():
        v = av_acc[...] - asum_acc[...] * c_ref[...]              # (K, D)
        n0 = jnp.sqrt(jnp.sum(v * v, axis=0, keepdims=True))      # over clusters
        v = v * pl.reciprocal(jnp.maximum(n0, _EPS), approx=True)
        n1 = jnp.sqrt(jnp.sum(v * v, axis=1, keepdims=True))      # over descr.
        v = v * pl.reciprocal(jnp.maximum(n1, _EPS), approx=True)
        out_ref[...] = v.astype(out_ref.dtype)


def encoder_forward(feat_bchw, w_lin, b_lin, C, alpha, *, tn_max=512):
    """Encoder head (Linear + NetVLAD) on a backbone feature map.

    feat_bchw : [B, E, H, W]  backbone features (any float dtype; bf16 ideal)
    w_lin     : [E, D]        Encoder.linear weight (already transposed)
    b_lin     : [D]           Encoder.linear bias
    C         : [K, D]        NetVLAD cluster centers
    alpha     : scalar        NetVLAD alpha (python float or traced scalar)
    Returns   : [B, K, D]     float32 VLAD descriptors
    """
    B, E, H, W = feat_bchw.shape
    D = w_lin.shape[1]
    K = C.shape[0]
    N = H * W

    # Native layout: [B,E,H,W] -> [B,E,N] is a pure reshape (no transpose, no
    # dtype cast); the feature tensor is streamed to the kernel as-is.
    feat = feat_bchw.reshape(B, E, N)

    # Spatial tile: a multiple of 128 lanes when N allows it (pipelined over
    # many steps), else the full spatial extent as a single block.
    if N % 128 == 0:
        tn = 128
        while tn * 2 <= min(N, tn_max) and N % (tn * 2) == 0:
            tn *= 2
    else:
        tn = N
    num_nt = N // tn

    # Resident parameters (tiny; DMA'd once, kept in VMEM across the grid).
    w_p = jnp.asarray(w_lin, jnp.bfloat16)                    # bf16 MXU operand
    b_p = jnp.asarray(b_lin, jnp.float32).reshape(1, D)
    C32 = jnp.asarray(C, jnp.float32)
    c2a = ((2.0 * alpha) * C32).astype(jnp.float32)           # fold 2*alpha
    clb = ((-alpha) * jnp.sqrt(jnp.sum(C32 * C32, axis=1))
           ).reshape(K, 1).astype(jnp.float32)

    # Explicit VMEM budget (v7x: 64 MiB physical / 32 MiB default scoped).
    feat_blk = E * tn * feat.dtype.itemsize
    w_blk = E * D * w_p.dtype.itemsize
    est = (2 * feat_blk + 2 * w_blk            # double-buffered streams
           + 8 * tn * D * 4                    # x/xn/logits/a temporaries
           + 8 * K * D * 4 + (2 << 20))        # params, accumulators, headroom
    vmem_limit = int(min(max(est, 8 << 20), 48 << 20))

    out = pl.pallas_call(
        _encoder_head_kernel,
        out_shape=jax.ShapeDtypeStruct((B, K, D), jnp.float32),
        grid_spec=pltpu.PrefetchScalarGridSpec(
            num_scalar_prefetch=0,
            grid=(B, num_nt),                  # batch parallel, reduction last
            in_specs=[
                pl.BlockSpec((None, E, tn), lambda b, n: (b, 0, n)),  # features
                pl.BlockSpec((E, D), lambda b, n: (0, 0)),            # W (bf16)
                pl.BlockSpec((1, D), lambda b, n: (0, 0)),            # bias
                pl.BlockSpec((K, D), lambda b, n: (0, 0)),            # 2*alpha*C
                pl.BlockSpec((K, D), lambda b, n: (0, 0)),            # C
                pl.BlockSpec((K, 1), lambda b, n: (0, 0)),            # conv bias
            ],
            out_specs=pl.BlockSpec((None, K, D), lambda b, n: (b, 0, 0)),
            scratch_shapes=[pltpu.VMEM((K, D), jnp.float32),   # sum_n a*xn
                            pltpu.VMEM((K, 1), jnp.float32)],  # sum_n a
        ),
        compiler_params=pltpu.CompilerParams(
            dimension_semantics=("parallel", "arbitrary"),
            vmem_limit_bytes=vmem_limit,
        ),
    )(feat, w_p, b_p, c2a, C32, clb)
    return out


def encoder_forward_ref(feat_bchw, w_lin, b_lin, C, alpha):
    """Pure-JAX transcription of the PyTorch forward (Linear + NetVLAD)."""
    B, E, H, W = feat_bchw.shape
    D = w_lin.shape[1]
    K = C.shape[0]

    x = jnp.transpose(feat_bchw, (0, 2, 3, 1))            # [B,H,W,E]
    x = x @ w_lin + b_lin                                  # [B,H,W,D]
    x = jnp.transpose(x, (0, 3, 1, 2))                     # [B,D,H,W]

    # NetVLAD.forward
    x = x.reshape(B, D, H * W)                             # flatten(start_dim=2)
    x = jnp.transpose(x, (2, 1, 0))[..., None]             # [N,D,B,1]
    N = x.shape[0]
    nrm = jnp.sqrt(jnp.sum(x * x, axis=1, keepdims=True))
    x = x / jnp.maximum(nrm, _EPS)

    cl_w = 2.0 * alpha * C                                 # conv weight [K,D]
    cl_b = -alpha * jnp.sqrt(jnp.sum(C * C, axis=1))       # conv bias   [K]
    S = jnp.einsum('ndbo,kd->nkbo', x, cl_w) + cl_b[None, :, None, None]
    S = S.reshape(N, K, -1)
    S = jax.nn.softmax(S, axis=1)                          # [N,K,B]

    x_flat = x.reshape(N, D, -1)                           # [N,D,B]
    R = x_flat[:, None, :, :] - C[None, :, :, None]        # [N,K,D,B]
    v = jnp.sum(R * S[:, :, None, :], axis=0)              # [K,D,B]
    v = v / jnp.maximum(jnp.sqrt(jnp.sum(v * v, axis=0, keepdims=True)), _EPS)
    v = v / jnp.maximum(jnp.sqrt(jnp.sum(v * v, axis=1, keepdims=True)), _EPS)
    return jnp.transpose(v, (2, 0, 1))                     # [B,K,D]


if __name__ == "__main__":
    key = jax.random.PRNGKey(0)
    k_feat, k_w, k_b, k_c = jax.random.split(key, 4)

    # Small shapes consistent with the module (encoder_dim=E, nV_ndescriptors=D,
    # nV_nclusters=K); D = 128 keeps the descriptor axis lane-aligned.
    B, E, H, W = 2, 32, 4, 4   # batch, encoder_dim, spatial
    D, K = 128, 8              # nV_ndescriptors, nV_nclusters
    alpha = 1.0                # nV_alpha

    # Deterministic stand-in for the resnet101 feature map, emitted in bf16
    # (the fast streaming path).  TODO(synk): the pretrained ResNet-101
    # backbone itself has no self-contained Pallas equivalent.
    feat = jax.random.normal(k_feat, (B, E, H, W), dtype=jnp.float32)
    feat = feat.astype(jnp.bfloat16)
    w_lin = 0.1 * jax.random.normal(k_w, (E, D), dtype=jnp.float32)
    b_lin = 0.1 * jax.random.normal(k_b, (D,), dtype=jnp.float32)
    C = jax.random.uniform(k_c, (K, D), dtype=jnp.float32)   # torch.rand(K, D)

    out = encoder_forward(feat, w_lin, b_lin, C, alpha)
    out = jax.block_until_ready(out)

    # Reference consumes the same bf16-quantized feature/weight values in f32,
    # so the residual mismatch is only MXU bf16 rounding + EUP approximate
    # reciprocals (output is double-L2-normalized, entries are in [-1, 1]).
    w_ref = jnp.asarray(w_lin, jnp.bfloat16).astype(jnp.float32)
    ref = encoder_forward_ref(feat.astype(jnp.float32), w_ref, b_lin, C, alpha)

    assert out.shape == (B, K, D)
    assert out.dtype == jnp.float32
    err = float(jnp.max(jnp.abs(out - ref)))
    assert err < 2e-2, f"Pallas Encoder/NetVLAD mismatch, max|err|={err}"
    print("KERNEL_OK")
</pallas_src>

<mosaic_0001>
module attributes {stable_mosaic.version = 11 : i64} {
  func.func @_encoder_head_kernel(%arg0: i32, %arg1: i32, %arg2: memref<1x32x16xbf16, #tpu.memory_space<vmem>>, %arg3: memref<32x128xbf16, #tpu.memory_space<vmem>>, %arg4: memref<1x128xf32, #tpu.memory_space<vmem>>, %arg5: memref<8x128xf32, #tpu.memory_space<vmem>>, %arg6: memref<8x128xf32, #tpu.memory_space<vmem>>, %arg7: memref<8x1xf32, #tpu.memory_space<vmem>>, %arg8: memref<1x8x128xf32, #tpu.memory_space<vmem>>, %arg9: memref<8x128xf32, #tpu.memory_space<vmem>>, %arg10: memref<8x1xf32, #tpu.memory_space<vmem>>) attributes {dimension_semantics = [#tpu.dimension_semantics<parallel>, #tpu.dimension_semantics<arbitrary>], iteration_bounds = array<i64: 2, 1>, scalar_prefetch = 0 : i64, scratch_operands = 2 : i64, tpu.core_type = #tpu.core_type<tc>, window_params = [{transform_indices = @transform_0, window_bounds = array<i64: 1, 32, 16>}, {pipeline_mode = #tpu.pipeline_mode<synchronous>, transform_indices = @transform_1, window_bounds = array<i64: 32, 128>}, {pipeline_mode = #tpu.pipeline_mode<synchronous>, transform_indices = @transform_2, window_bounds = array<i64: 1, 128>}, {pipeline_mode = #tpu.pipeline_mode<synchronous>, transform_indices = @transform_3, window_bounds = array<i64: 8, 128>}, {pipeline_mode = #tpu.pipeline_mode<synchronous>, transform_indices = @transform_4, window_bounds = array<i64: 8, 128>}, {pipeline_mode = #tpu.pipeline_mode<synchronous>, transform_indices = @transform_5, window_bounds = array<i64: 8, 1>}, {transform_indices = @transform_6, window_bounds = array<i64: 1, 8, 128>}]} {
    %c0_i32 = arith.constant 0 : i32
    %0 = arith.cmpi eq, %arg1, %c0_i32 : i32
    %1 = arith.extui %0 : i1 to i32
    %c0_i32_0 = arith.constant 0 : i32
    %2 = arith.cmpi ne, %1, %c0_i32_0 : i32
    scf.if %2 {
      %cst_28 = arith.constant 0.000000e+00 : f32
      %46 = vector.broadcast %cst_28 : f32 to vector<8x128xf32>
      %c0_29 = arith.constant 0 : index
      %c0_30 = arith.constant 0 : index
      %47 = vector.load %arg9[%c0_29, %c0_30] : memref<8x128xf32, #tpu.memory_space<vmem>>, vector<8x128xf32>
      tpu.vector_store %arg9[%c0_29, %c0_30], %46 {strides = array<i32>} : memref<8x128xf32, #tpu.memory_space<vmem>>, vector<8x128xf32>,
      %cst_31 = arith.constant 0.000000e+00 : f32
      %48 = vector.broadcast %cst_31 : f32 to vector<8x1xf32>
      %c0_32 = arith.constant 0 : index
      %c0_33 = arith.constant 0 : index
      %49 = vector.load %arg10[%c0_32, %c0_33] : memref<8x1xf32, #tpu.memory_space<vmem>>, vector<8x1xf32>
      tpu.vector_store %arg10[%c0_32, %c0_33], %48 {strides = array<i32>} : memref<8x1xf32, #tpu.memory_space<vmem>>, vector<8x1xf32>,
    } else {
    }
    %c0 = arith.constant 0 : index
    %c0_1 = arith.constant 0 : index
    %c0_2 = arith.constant 0 : index
    %3 = vector.load %arg2[%c0, %c0_1, %c0_2] : memref<1x32x16xbf16, #tpu.memory_space<vmem>>, vector<1x32x16xbf16>
    %4 = vector.shape_cast %3 : vector<1x32x16xbf16> to vector<32x16xbf16>
    %c0_3 = arith.constant 0 : index
    %c0_4 = arith.constant 0 : index
    %5 = vector.load %arg3[%c0_3, %c0_4] : memref<32x128xbf16, #tpu.memory_space<vmem>>, vector<32x128xbf16>
    %cst = arith.constant dense<0.000000e+00> : vector<16x128xf32>
    %6 = tpu.matmul %4, %5, %cst {dimension_numbers = #tpu.dot_dimension_numbers<[0], [0], [1], [1], [0, 1, 1, 1], [], []>} : vector<32x16xbf16>, vector<32x128xbf16>, vector<16x128xf32> -> vector<16x128xf32>
    %c0_5 = arith.constant 0 : index
    %c0_6 = arith.constant 0 : index
    %7 = vector.load %arg4[%c0_5, %c0_6] : memref<1x128xf32, #tpu.memory_space<vmem>>, vector<1x128xf32>
    %8 = vector.broadcast %7 : vector<1x128xf32> to vector<16x128xf32>
    %9 = arith.addf %6, %8 : vector<16x128xf32>
    %10 = arith.mulf %9, %9 : vector<16x128xf32>
    %cst_7 = arith.constant dense<0.000000e+00> : vector<16xf32>
    %11 = vector.multi_reduction <add>, %10, %cst_7 [1] : vector<16x128xf32> to vector<16xf32>
    %12 = vector.shape_cast %11 : vector<16xf32> to vector<16x1xf32>
    %13 = math.sqrt %12 : vector<16x1xf32>
    %cst_8 = arith.constant 9.99999996E-13 : f32
    %14 = vector.broadcast %cst_8 : f32 to vector<16x1xf32>
    %15 = arith.maximumf %13, %14 : vector<16x1xf32>
    %16 = tpu.reciprocal %15 {approx = true} : vector<16x1xf32> -> vector<16x1xf32>
    %17 = vector.broadcast %16 : vector<16x1xf32> to vector<16x128xf32>
    %18 = arith.mulf %9, %17 : vector<16x128xf32>
    %c0_9 = arith.constant 0 : index
    %c0_10 = arith.constant 0 : index
    %19 = vector.load %arg5[%c0_9, %c0_10] : memref<8x128xf32, #tpu.memory_space<vmem>>, vector<8x128xf32>
    %cst_11 = arith.constant dense<0.000000e+00> : vector<8x16xf32>
    %20 = tpu.matmul %19, %18, %cst_11 {dimension_numbers = #tpu.dot_dimension_numbers<[1], [1], [0], [0], [0, 0, 1, 0], [], []>} : vector<8x128xf32>, vector<16x128xf32>, vector<8x16xf32> -> vector<8x16xf32>
    %c0_12 = arith.constant 0 : index
    %c0_13 = arith.constant 0 : index
    %21 = vector.load %arg7[%c0_12, %c0_13] : memref<8x1xf32, #tpu.memory_space<vmem>>, vector<8x1xf32>
    %22 = vector.broadcast %21 : vector<8x1xf32> to vector<8x16xf32>
    %23 = arith.addf %20, %22 : vector<8x16xf32>
    %cst_14 = arith.constant dense<0xFF800000> : vector<16xf32>
    %24 = vector.multi_reduction <maximumf>, %23, %cst_14 [0] : vector<8x16xf32> to vector<16xf32>
    %25 = vector.shape_cast %24 : vector<16xf32> to vector<1x16xf32>
    %26 = vector.broadcast %25 : vector<1x16xf32> to vector<8x16xf32>
    %27 = arith.subf %23, %26 : vector<8x16xf32>
    %28 = math.exp %27 : vector<8x16xf32>
    %cst_15 = arith.constant dense<0.000000e+00> : vector<16xf32>
    %29 = vector.multi_reduction <add>, %28, %cst_15 [0] : vector<8x16xf32> to vector<16xf32>
    %30 = vector.shape_cast %29 : vector<16xf32> to vector<1x16xf32>
    %31 = tpu.reciprocal %30 {approx = true} : vector<1x16xf32> -> vector<1x16xf32>
    %32 = vector.broadcast %31 : vector<1x16xf32> to vector<8x16xf32>
    %33 = arith.mulf %28, %32 : vector<8x16xf32>
    %c0_16 = arith.constant 0 : index
    %c0_17 = arith.constant 0 : index
    %34 = vector.load %arg9[%c0_16, %c0_17] : memref<8x128xf32, #tpu.memory_space<vmem>>, vector<8x128xf32>
    %cst_18 = arith.constant dense<0.000000e+00> : vector<8x128xf32>
    %35 = tpu.matmul %33, %18, %cst_18 {dimension_numbers = #tpu.dot_dimension_numbers<[1], [0], [0], [1], [0, 0, 1, 1], [], []>} : vector<8x16xf32>, vector<16x128xf32>, vector<8x128xf32> -> vector<8x128xf32>
    %36 = arith.addf %34, %35 : vector<8x128xf32>
    %c0_19 = arith.constant 0 : index
    %c0_20 = arith.constant 0 : index
    %37 = vector.load %arg9[%c0_19, %c0_20] : memref<8x128xf32, #tpu.memory_space<vmem>>, vector<8x128xf32>
    tpu.vector_store %arg9[%c0_19, %c0_20], %36 {strides = array<i32>} : memref<8x128xf32, #tpu.memory_space<vmem>>, vector<8x128xf32>,
    %c0_21 = arith.constant 0 : index
    %c0_22 = arith.constant 0 : index
    %38 = vector.load %arg10[%c0_21, %c0_22] : memref<8x1xf32, #tpu.memory_space<vmem>>, vector<8x1xf32>
    %cst_23 = arith.constant dense<0.000000e+00> : vector<8xf32>
    %39 = vector.multi_reduction <add>, %33, %cst_23 [1] : vector<8x16xf32> to vector<8xf32>
    %40 = vector.shape_cast %39 : vector<8xf32> to vector<8x1xf32>
    %41 = arith.addf %38, %40 : vector<8x1xf32>
    %c0_24 = arith.constant 0 : index
    %c0_25 = arith.constant 0 : index
    %42 = vector.load %arg10[%c0_24, %c0_25] : memref<8x1xf32, #tpu.memory_space<vmem>>, vector<8x1xf32>
    tpu.vector_store %arg10[%c0_24, %c0_25], %41 {strides = array<i32>} : memref<8x1xf32, #tpu.memory_space<vmem>>, vector<8x1xf32>,
    %c0_i32_26 = arith.constant 0 : i32
    %43 = arith.cmpi eq, %arg1, %c0_i32_26 : i32
    %44 = arith.extui %43 : i1 to i32
    %c0_i32_27 = arith.constant 0 : i32
    %45 = arith.cmpi ne, %44, %c0_i32_27 : i32
    scf.if %45 {
      %c0_28 = arith.constant 0 : index
      %c0_29 = arith.constant 0 : index
      %46 = vector.load %arg9[%c0_28, %c0_29] : memref<8x128xf32, #tpu.memory_space<vmem>>, vector<8x128xf32>
      %c0_30 = arith.constant 0 : index
      %c0_31 = arith.constant 0 : index
      %47 = vector.load %arg10[%c0_30, %c0_31] : memref<8x1xf32, #tpu.memory_space<vmem>>, vector<8x1xf32>
      %c0_32 = arith.constant 0 : index
      %c0_33 = arith.constant 0 : index
      %48 = vector.load %arg6[%c0_32, %c0_33] : memref<8x128xf32, #tpu.memory_space<vmem>>, vector<8x128xf32>
      %49 = vector.broadcast %47 : vector<8x1xf32> to vector<8x128xf32>
      %50 = arith.mulf %49, %48 : vector<8x128xf32>
      %51 = arith.subf %46, %50 : vector<8x128xf32>
      %52 = arith.mulf %51, %51 : vector<8x128xf32>
      %cst_34 = arith.constant dense<0.000000e+00> : vector<128xf32>
      %53 = vector.multi_reduction <add>, %52, %cst_34 [0] : vector<8x128xf32> to vector<128xf32>
      %54 = vector.shape_cast %53 : vector<128xf32> to vector<1x128xf32>
      %55 = math.sqrt %54 : vector<1x128xf32>
      %cst_35 = arith.constant 9.99999996E-13 : f32
      %56 = vector.broadcast %cst_35 : f32 to vector<1x128xf32>
      %57 = arith.maximumf %55, %56 : vector<1x128xf32>
      %58 = tpu.reciprocal %57 {approx = true} : vector<1x128xf32> -> vector<1x128xf32>
      %59 = vector.broadcast %58 : vector<1x128xf32> to vector<8x128xf32>
      %60 = arith.mulf %51, %59 : vector<8x128xf32>
      %61 = arith.mulf %60, %60 : vector<8x128xf32>
      %cst_36 = arith.constant dense<0.000000e+00> : vector<8xf32>
      %62 = vector.multi_reduction <add>, %61, %cst_36 [1] : vector<8x128xf32> to vector<8xf32>
      %63 = vector.shape_cast %62 : vector<8xf32> to vector<8x1xf32>
      %64 = math.sqrt %63 : vector<8x1xf32>
      %cst_37 = arith.constant 9.99999996E-13 : f32
      %65 = vector.broadcast %cst_37 : f32 to vector<8x1xf32>
      %66 = arith.maximumf %64, %65 : vector<8x1xf32>
      %67 = tpu.reciprocal %66 {approx = true} : vector<8x1xf32> -> vector<8x1xf32>
      %68 = vector.broadcast %67 : vector<8x1xf32> to vector<8x128xf32>
      %69 = arith.mulf %60, %68 : vector<8x128xf32>
      %c0_38 = arith.constant 0 : index
      %c0_39 = arith.constant 0 : index
      %c0_40 = arith.constant 0 : index
      %70 = vector.load %arg8[%c0_38, %c0_39, %c0_40] : memref<1x8x128xf32, #tpu.memory_space<vmem>>, vector<1x8x128xf32>
      %71 = vector.shape_cast %70 : vector<1x8x128xf32> to vector<8x128xf32>
      %72 = vector.shape_cast %69 : vector<8x128xf32> to vector<1x8x128xf32>
      tpu.vector_store %arg8[%c0_38, %c0_39, %c0_40], %72 {strides = array<i32>} : memref<1x8x128xf32, #tpu.memory_space<vmem>>, vector<1x8x128xf32>,
    } else {
    }
    return
  }
  func.func @transform_0(%arg0: i32, %arg1: i32) -> (i32, i32, i32) {
    %c0_i32 = arith.constant 0 : i32
    %c0_i32_0 = arith.constant 0 : i32
    return %arg0, %c0_i32, %arg1 : i32, i32, i32
  }
  func.func @transform_1(%arg0: i32, %arg1: i32) -> (i32, i32) {
    %c0_i32 = arith.constant 0 : i32
    %c0_i32_0 = arith.constant 0 : i32
    %c0_i32_1 = arith.constant 0 : i32
    return %c0_i32, %c0_i32_0 : i32, i32
  }
  func.func @transform_2(%arg0: i32, %arg1: i32) -> (i32, i32) {
    %c0_i32 = arith.constant 0 : i32
    %c0_i32_0 = arith.constant 0 : i32
    %c0_i32_1 = arith.constant 0 : i32
    return %c0_i32, %c0_i32_0 : i32, i32
  }
  func.func @transform_3(%arg0: i32, %arg1: i32) -> (i32, i32) {
    %c0_i32 = arith.constant 0 : i32
    %c0_i32_0 = arith.constant 0 : i32
    %c0_i32_1 = arith.constant 0 : i32
    return %c0_i32, %c0_i32_0 : i32, i32
  }
  func.func @transform_4(%arg0: i32, %arg1: i32) -> (i32, i32) {
    %c0_i32 = arith.constant 0 : i32
    %c0_i32_0 = arith.constant 0 : i32
    %c0_i32_1 = arith.constant 0 : i32
    return %c0_i32, %c0_i32_0 : i32, i32
  }
  func.func @transform_5(%arg0: i32, %arg1: i32) -> (i32, i32) {
    %c0_i32 = arith.constant 0 : i32
    %c0_i32_0 = arith.constant 0 : i32
    %c0_i32_1 = arith.constant 0 : i32
    return %c0_i32, %c0_i32_0 : i32, i32
  }
  func.func @transform_6(%arg0: i32, %arg1: i32) -> (i32, i32, i32) {
    %c0_i32 = arith.constant 0 : i32
    %c0_i32_0 = arith.constant 0 : i32
    %c0_i32_1 = arith.constant 0 : i32
    return %arg0, %c0_i32, %c0_i32_0 : i32, i32, i32
  }
}

</mosaic_0001>

<bundles_post_ra>
// kernel: tpu_custom_call.1
= control target key start
LH: loop header
LB: loop body
LE: loop exit
PB: predicated region body
PF: predicated region fallthrough
CT: control target
= control target key end

     0   :  { %11 = vsyncpa [#allocation5], 0  ;;  %s1125_s0 = inlined_call_operand.vmem [shape: bf16[2,32,16], index: 0, kind: input, shape index: {}]   ;;  %s1126_s1 = inlined_call_operand.vmem [shape: bf16[32,128], index: 1, kind: input, shape index: {}]   ;;  %s1127_s2 = inlined_call_operand.vmem [shape: f32[1,128], index: 2, kind: input, shape index: {}]   ;;  %s1128_s3 = inlined_call_operand.vmem [shape: f32[8,128], index: 3, kind: input, shape index: {}]   ;;  %s1129_s4 = inlined_call_operand.vmem [shape: f32[8,128], index: 4, kind: input, shape index: {}]   ;;  %s1130_s5 = inlined_call_operand.vmem [shape: f32[8,1], index: 5, kind: input, shape index: {}]   ;;  %s1131_s6 = inlined_call_operand.hbm [shape: f32[2,8,128], index: 6, kind: output, shape index: {}]  }
   0x1   :  { %13 = vsyncpa [#allocation5 + $0x1], 0  ;;  %s980_s21 = smov 0   ;;  %s982_s22 = smov 0  }
   0x2   :  { %s984_s23 = smov 0   ;;  %s986_s24 = smov 0  }
   0x3   :  { %s988_s25 = smov 0   ;;  %s990_s26 = smov 0  }
   0x4 LB: > { %s718_s27 = sadd.s32 4294967295, %s938_s26   ;;  %s719_s28 = sadd.s32 4294967294, %s938_s26   ;;  %s938_s26 = sphi %s990_s26, %s19_s26   ;;  %s934_s25 = sphi %s988_s25, %s1138_s25   ;;  %s930_s24 = sphi %s986_s24, %s1137_s24   ;;  %s926_s23 = sphi %s984_s23, %s1136_s23   ;;  %s922_s22 = sphi %s982_s22, %s1135_s22   ;;  %s918_s21 = sphi %s980_s21, %s1134_s21  }
   0x5   : > { %s31_s29 = sadd.s32 1, %s934_s25  ;;  %s171_s30 = sadd.s32 1, %s926_s23 }
   0x6   : > { %p33_p0 = scmp.ge.s32.totalorder %s31_s29, 2  ;;  %p181_p1 = scmp.ne.s32.totalorder %s926_s23, %s922_s22 }
   0x7   : > { %p182_p2 = scmp.eq.s32.totalorder %s718_s27, 1  ;;  %p187_p3 = scmp.ne.s32.totalorder %s922_s22, %s918_s21 }
   0x8   : > { %s1140_s29 = smov (%p33_p0, %s31_s29), 0  ;;  %p188_p5 = scmp.eq.s32.totalorder %s719_s28, 1 }
   0x9   : > { %p1020_p4 = por %p182_p2, %p181_p1  ;;  %s168_s8 = ssub.s32 %s934_s25, %s1140_s29 }
   0xa   : > { %p722_p6 = scmp.ge.s32.totalorder %s938_s26, 1  ;;  %p169_p7 = scmp.eq.s32.totalorder %s168_s8, 0 }
   0xb   : > { %p1027_p8 = por %p188_p5, %p187_p3  ;;  %p232_p9 = scmp.lt.s32.totalorder %s938_s26, 3 }
   0xc   : > { %s1033_s10 = scalar_select %p169_p7, %s926_s23, %s171_s30  }
   0xd   : > { %p233_p10 = pnand %p722_p6, %p232_p9 }
   0xe   : > { %p265_p11 = scmp.lt.s32.totalorder (!%p233_p10), %s930_s24, 1  ;;  %v940_v0 = vmov (!%p233_p10), 0.0   ;;  %v838_v1 = vld [vmem:[%s1126_s1] sm:$0xff] (!%p233_p10)   ;;  %vm941_vm0 = vmmov (!%p233_p10), 0   ;;  %v839_v2 = vld [vmem:[%s1126_s1 + $0x8] sm:$0xff] (!%p233_p10)   ;;  %vm336_vm1 = vcmask (!%p233_p10), 261120  }
   0xf   : > { %236 = sbr.rel (%p233_p10) target bundleno = 1316 (0x524), region = 44  ;;  %747 = vmatprep.subr.bf16.mxu0 (!%p233_p10), %v940_v0  ;;  %751 = vmatprep.mubr.msk.bf16.mxu0 (!%p233_p10), %vm941_vm0, %v940_v0  ;;  %v726_v6 = vld [vmem:[%s1127_s2] ss:$0 sm:$0xff] (!%p233_p10)  ;;  %v942_v15 = vmov (!%p233_p10), 0.0|0.0   ;;  %v943_v17 = vmov (!%p233_p10), 0   ;;  %vm279_vm6 = vcmask (!%p233_p10), 7168  }
  0x10   : > { %759 = vmatprep.mubr.msk.f32.mxu1 (!%p233_p10), %vm941_vm0, %v940_v0  ;;  %748 = vmatpush3.bf16.msra.mxu0 (!%p233_p10), %v838_v1  ;;  %v408_v16 = vld [vmem:[%s1130_s5] sm:$0xff] (!%p233_p10)  ;;  %280 = vst.msk [vmem:[#allocation3] sm:$0xff] (!%p233_p10), %vm279_vm6, %v940_v0  ;;  %vm484_vm7 = vcmask (!%p233_p10), 130048   ;;  %s262_s14 = sand.u32 (!%p233_p10), 1, %s922_s22  }
  0x11   : > { %749 = vmatprep.subr.bf16.mxu0 (!%p233_p10), %v940_v0  ;;  %769 = vmatprep.subr.bf16.mxu1 (!%p233_p10), %v942_v15  ;;  %v407_v37 = vld [vmem:[%s1128_s3] sm:$0xff] (!%p233_p10)  ;;  %s723_s15 = sshll.u32 (!%p233_p10), %s262_s14, 3  ;;  %s632_s28 = scalar_lea.sflag (!%p233_p10), [#allocation5], %s262_s14 }
  0x12   : > { %835 = vset.pattern.permute.xlu1 (!%p233_p10), %v943_v17  ;;  %s264_s17 = scalar_lea.vmem (!%p233_p10), [#allocation4], %s723_s15 }
  0x13   : > { %s645_s18 = sshll.u32 (!%p233_p10), %s264_s17, 4  ;;  %s1080_s18 = int_to_ptr.vmem [resolvable:$true] %s645_s18 }
  0x14   : > { %750 = vmatpush3.bf16.msra.mxu0 (!%p233_p10), %v839_v2  ;;  %s860_s30 = scalar_lea.vmem (!%p233_p10), %s1080_s18, 128 }
  0x15   : > { %p861_p12 = scmp.ne.s32.totalorder (!%p233_p10), %s1080_s18, %s860_s30 }
  0x16   : > { %s266_s13 = scalar_select %p265_p11, %s930_s24, 1 }
  0x17   : > { %v580_v62 = vld [vmem:[#allocation3] sm:$0xff]  ;;  %p862_p13 = pnand %p861_p12, %p1020_p4 }
  0x18   : > { %s737_s16 = sshll.u32 %s266_s13, 4 }
  0x19   : > { %s272_s19 = scalar_lea.vmem %s1125_s0, %s737_s16  ;;  %s734_s16 = sshll.u32 %s930_s24, 7 }
  0x1a   : > { %v836_v3 = vld [vmem:[%s272_s19] sm:$0xff]   ;;  %v837_v4 = vld [vmem:[%s272_s19 + $0x8] sm:$0xff]   ;;  %s1078_s27 = scalar_lea.hbm %s1131_s6, %s734_s16  ;;  %p863_p0 = pneg %p862_p13 }
  0x1b   : > { %308 = vxpose.xlu0.c.b16.start [1/2] (short) (narrow) %v836_v3, 16  ;;  %s944_s24 = smov [#allocation4]  }
  0x1c   : > { %s864_s8 = sshll.u32 %s944_s24, 4  ;;  %s865_s8 = int_to_ptr.vmem [resolvable:$false] %s864_s8 }
  0x1d   : > { %s866_s11 = scalar_lea.vmem %s865_s8, 256  ;;  %p867_p1 = scmp.lt.s32.totalorder %s1080_s18, %s865_s8 }
  0x1e   : > { %p868_p2 = scmp.lt.s32.totalorder %s866_s11, %s860_s30 }
  0x1f   : > { %309 = vxpose.xlu0.c.b16.end [2/2] (short) (narrow) %v837_v4, 16  ;;  %v592_v4 = vld [vmem:[%s1129_s4] sm:$0xff] }
  0x20   : > { %p869_p3 = por %p868_p2, %p867_p1 }
  0x22   : > { %p870_p5 = pnand %p869_p3, %p863_p0 }
  0x28   : > { %834 = vset.pattern.permute.xlu0 %v943_v17 }
  0x29   : > { %411 = vperm.xlu0 %834, %v408_v16  }
  0x81   : > { %v316_v5 = vpop.trf.xlu0 }
  0x82   : > { %752 = vmatmul.mubr.msk.bf16.vlgmr.msra.gmra.mrb[0].mxu0 %vm336_vm1, %v316_v5 }
  0xa8   : > { %v412_v38 = vpop.permute.xlu0 %411 }
 0x155   : > { %v374_v7 = vpop.f32.mrb[0].mxu0 }
 0x156   : > { %v375_v8 = vadd.f32 %v726_v6, %v374_v7  ;;  %v753_v9 = vpop.f32.mrb[1].mxu0 }
 0x157   : > { %v377_v10 = vpop.f32.mrb[2].mxu0 }
 0x158   : > { %v378_v11 = vadd.f32 %v726_v6, %v377_v10  ;;  %v754_v12 = vpop.f32.mrb[3].mxu0  ;;  %v381_v13 = vmul.f32 %v375_v8, %v375_v8 }
 0x15a   : > { %383 = vadd.xlane.f32.xlu1 %v381_v13  ;;  %v382_v14 = vmul.f32 %v378_v11, %v378_v11 }
 0x15e   : > { %385 = vadd.xlane.f32.xlu1 %v382_v14 }
 0x1e7   : > { %v384_v18 = vpop.xlane.xlu1 %383 }
 0x1e8   : > { %840 = vrsqrt.f32 %v384_v18  ;;  %vm389_vm2 = vcmp.eq.f32.partialorder %v384_v18, inf  ;;  %v392_v22 = vand.u32 2147483648, %v384_v18  ;;  %vm391_vm3 = vcmp.eq.f32.partialorder %v384_v18, 0.0 }
 0x1eb   : > { %v386_v19 = vpop.xlane.xlu1 %385 }
 0x1ec   : > { %842 = vrsqrt.f32 %v386_v19  ;;  %vm396_vm4 = vcmp.eq.f32.partialorder %v386_v19, inf  ;;  %v399_v28 = vand.u32 2147483648, %v386_v19  ;;  %vm398_vm5 = vcmp.eq.f32.partialorder %v386_v19, 0.0 }
 0x1f2   : > { %v841_v20 = vpop.eup %840 }
 0x1f3   : > { %v388_v21 = vmul.f32 %v841_v20, %v384_v18 }
 0x1f5   : > { %v390_v23 = vsel %vm389_vm2, %v384_v18, %v388_v21 }
 0x1f6   : > { %v843_v24 = vpop.eup %842  ;;  %v393_v25 = vsel %vm391_vm3, %v392_v22, %v390_v23 }
 0x1f7   : > { %v401_v26 = vmax.f32 %v393_v25, 1e-12  ;;  %v395_v27 = vmul.f32 %v843_v24, %v386_v19 }
 0x1f9   : > { %v397_v29 = vsel %vm396_vm4, %v386_v19, %v395_v27  ;;  %844 = vrcp.f32 %v401_v26 }
 0x1fa   : > { %v400_v30 = vsel %vm398_vm5, %v399_v28, %v397_v29 }
 0x1fb   : > { %v402_v31 = vmax.f32 %v400_v30, 1e-12 }
 0x1fd   : > { %846 = vrcp.f32 %v402_v31 }
 0x203   : > { %v845_v32 = vpop.eup %844 }
 0x204   : > { %v405_v34 = vmul.f32 %v845_v32, %v375_v8 }
 0x207   : > { %v847_v33 = vpop.eup %846 }
 0x208   : > { %v406_v35 = vmul.f32 %v847_v33, %v378_v11 }
 0x20a   : > { %v770_v36 = vpack.c.bf16 %v406_v35, %v405_v34 }
 0x20c   : > { %771 = vmatpush3.bf16.xpose.msra.mxu1 %v770_v36 }
 0x20d   : > { %772 = vmatprep.subr.bf16.mxu1 %v942_v15 }
 0x213   : > { %760 = vmatmul.mubr.f32.vlgmr.msra.gmra.mrb[0].mxu1 %v407_v37 }
 0x214   : > { %774 = vmatpush3.bf16.msra.mxu1 %v770_v36  ;;  %766 = vmatprep.mubr.msk.f32.mxu1 %vm941_vm0, %v940_v0 }
 0x2e6   : > { %v480_v39 = vpop.f32.mrb[0].mxu1 }
 0x2e7   : > { %v481_v40 = vadd.f32 %v480_v39, %v412_v38  ;;  %v761_v41 = vpop.f32.mrb[1].mxu1 }
 0x2e9   : > { %v485_v42 = vsel %vm484_vm7, %v481_v40, -inf }
 0x2ea   : > { %v486_v43 = vrot.slane %v485_v42, 4 }
 0x2ec   : > { %v487_v44 = vmax.f32 %v485_v42, %v486_v43 }
 0x2ee   : > { %v488_v45 = vrot.slane %v487_v44, 2 }
 0x2f0   : > { %v489_v46 = vmax.f32 %v487_v44, %v488_v45 }
 0x2f2   : > { %v490_v47 = vrot.slane %v489_v46, 1 }
 0x2f4   : > { %v491_v48 = vmax.f32 %v489_v46, %v490_v47 }
 0x2f6   : > { %v492_v49 = vsub.f32 %v481_v40, %v491_v48 }
 0x2f8   : > { %v493_v50 = vmul.f32 1.442695, %v492_v49 }
 0x2fa   : > { %848 = vpow2.f32 %v493_v50 }
 0x304   : > { %v849_v51 = vpop.eup %848 }
 0x305   : > { %v495_v52 = vsel %vm484_vm7, %v849_v51, 0.0 }
 0x306   : > { %v496_v53 = vrot.slane %v495_v52, 4 }
 0x308   : > { %v497_v54 = vadd.f32 %v496_v53, %v495_v52 }
 0x30a   : > { %v498_v55 = vrot.slane %v497_v54, 2 }
 0x30c   : > { %v499_v56 = vadd.f32 %v498_v55, %v497_v54 }
 0x30e   : > { %v500_v57 = vrot.slane %v499_v56, 1 }
 0x310   : > { %v501_v58 = vadd.f32 %v500_v57, %v499_v56 }
 0x312   : > { %850 = vrcp.f32 %v501_v58 }
 0x31c   : > { %v851_v59 = vpop.eup %850 }
 0x31d   : > { %v503_v60 = vmul.f32 %v851_v59, %v849_v51 }
 0x31f   : > { %767 = vmatmul.mubr.msk.f32.vlgmr.msra.gmra.mrb[2].mxu1 %vm484_vm7, %v503_v60  ;;  %v581_v61 = vsel %vm484_vm7, %v503_v60, 0.0 }
 0x320   : > { %582 = vadd.xlane.f32.xlu1 %v581_v61 }
 0x3ad   : > { %v583_v63 = vpop.xlane.xlu1 %582 }
 0x3ae   : > { %v584_v0 = vadd.f32 %v583_v63, %v580_v62 }
 0x3b0   : > { %586 = vst.msk [vmem:[#allocation3] sm:$0xff] %vm279_vm6, %v584_v0 }
 0x3b7   : > { %v591_v1 = vld [vmem:[#allocation3] sm:$0xff] }
 0x3b8   : > { %595 = vperm.xlu1 %835, %v591_v1  }
 0x3f2   : > { %v574_v2 = vpop.f32.mrb[2].mxu1 }
 0x3f3   : > { %v768_v3 = vpop.f32.mrb[3].mxu1 }
 0x437   : > { %v596_v5 = vpop.permute.xlu1 %595 }
 0x438   : > { %v598_v6 = vmul.f32 %v596_v5, %v592_v4 }
 0x43a   : > { %v599_v7 = vsub.f32 %v574_v2, %v598_v6 }
 0x43c   : > { %v600_v8 = vmul.f32 %v599_v7, %v599_v7 }
 0x43e   : > { %v601_v9 = vrot.slane %v600_v8, 4 }
 0x440   : > { %v602_v10 = vadd.f32 %v601_v9, %v600_v8 }
 0x442   : > { %v603_v11 = vrot.slane %v602_v10, 2 }
 0x444   : > { %v604_v12 = vadd.f32 %v603_v11, %v602_v10 }
 0x446   : > { %v605_v13 = vrot.slane %v604_v12, 1 }
 0x448   : > { %v606_v14 = vadd.f32 %v605_v13, %v604_v12 }
 0x44a   : > { %852 = vrsqrt.f32 %v606_v14  ;;  %vm609_vm8 = vcmp.eq.f32.partialorder %v606_v14, inf  ;;  %v612_v17 = vand.u32 2147483648, %v606_v14  ;;  %vm611_vm9 = vcmp.eq.f32.partialorder %v606_v14, 0.0 }
 0x454   : > { %v853_v15 = vpop.eup %852 }
 0x455   : > { %v608_v16 = vmul.f32 %v853_v15, %v606_v14 }
 0x457   : > { %v610_v18 = vsel %vm609_vm8, %v606_v14, %v608_v16 }
 0x458   : > { %v613_v19 = vsel %vm611_vm9, %v612_v17, %v610_v18 }
 0x459   : > { %v614_v20 = vmax.f32 %v613_v19, 1e-12 }
 0x45b   : > { %854 = vrcp.f32 %v614_v20 }
 0x465   : > { %v855_v21 = vpop.eup %854 }
 0x466   : > { %v616_v22 = vmul.f32 %v855_v21, %v599_v7 }
 0x468   : > { %v617_v23 = vmul.f32 %v616_v22, %v616_v22 }
 0x46a   : > { %618 = vadd.xlane.f32.xlu0 %v617_v23 }
 0x4f7   : > { %v619_v24 = vpop.xlane.xlu0 %618 }
 0x4f8   : > { %856 = vrsqrt.f32 %v619_v24  ;;  %vm622_vm10 = vcmp.eq.f32.partialorder %v619_v24, inf  ;;  %v625_v27 = vand.u32 2147483648, %v619_v24  ;;  %vm624_vm11 = vcmp.eq.f32.partialorder %v619_v24, 0.0 }
 0x502   : > { %v857_v25 = vpop.eup %856 }
 0x503   : > { %v621_v26 = vmul.f32 %v857_v25, %v619_v24 }
 0x505   : > { %v623_v28 = vsel %vm622_vm10, %v619_v24, %v621_v26 }
 0x506   : > { %v626_v29 = vsel %vm624_vm11, %v625_v27, %v623_v28 }
 0x507   : > { %v627_v30 = vmax.f32 %v626_v29, 1e-12 }
 0x509   : > { %858 = vrcp.f32 %v627_v30 }
 0x513   : > { %v859_v31 = vpop.eup %858 }
 0x514   : > { %v629_v32 = vmul.f32 %v859_v31, %v616_v22 }
 0x516   : > { %630 = vst [vmem:[%s264_s17] sm:$0xff] %v629_v32 }
 0x517   : > { %873 = shalt.err (!%p870_p5)
}
 0x518   : > { %s874_s12 = scalar_lea.hbm %s1078_s27, 128  ;;  %s878_s15 = scalar_lea.hbm %s1131_s6, 256 }
 0x519   : > { %p875_p6 = scmp.ne.s32.totalorder %s1078_s27, %s874_s12  ;;  %p879_p10 = scmp.lt.u32.totalorder %s1078_s27, %s1131_s6 }
 0x51a   : > { %p880_p11 = scmp.lt.u32.totalorder %s878_s15, %s874_s12  ;;  %p882_p13 = scmp.lt.u32.totalorder %s874_s12, %s1078_s27 }
 0x51b   : > { %p876_p7 = pnand %p875_p6, %p1020_p4 }
 0x51c   : > { %p881_p12 = por %p880_p11, %p879_p10 }
 0x51d   : > { %p877_p9 = pneg %p876_p7 }
 0x51e   : > { %p883_p0 = por %p882_p13, %p881_p12 }
 0x520   : > { %p884_p1 = pnand %p883_p0, %p877_p9 }
 0x522   : > { %887 = shalt.err (!%p884_p1)
}
 0x523   : > { %775 = dma.vmem_to_hbm [thread:$0]  (%p1020_p4), %s1080_s18, 128, %s1078_s27, %s632_s28  }
 0x524 PF: > { %p781_p2 = scmp.ge.s32.totalorder %s938_s26, 2  ;;  %s657_s19 = sand.u32 1, %s918_s21  }
 0x525   : > { %s658_s20 = scalar_lea.sflag [#allocation5], %s657_s19 }
 0x526   : > { %p778_p3 = pnand %p781_p2, %p1027_p8 }
 0x528   : > { %913 = dma.done.wait (!%p778_p3), %s658_s20, 128  }
 0x529   : > { %915 = vsyncadd (!%p778_p3), %s658_s20, 4294967168  ;;  %s19_s26 = sadd.s32 1, %s938_s26   ;;  %s1134_s21 = smov %s922_s22 }
 0x52a   : > { %p16_p5 = scmp.ge.s32.totalorder %s19_s26, 4   ;;  %s1135_s22 = smov %s926_s23 }
 0x52b   : > { %s1136_s23 = smov %s1033_s10  ;;  %s1137_s24 = smov %s934_s25 }
 0x52c   : > { %s1138_s25 = smov %s1140_s29  ;;  %18 = sbr.rel (!%p16_p5) target bundleno = 4 (0x4), region = 87 }
 0x533   :  { %663 = vsyncpa [#allocation5], 1 }
 0x534   :  { %665 = vsyncpa [#allocation5 + $0x1], 1 }

</bundles_post_ra>
